<compile_context>
chip_gen: v5e
topology: v5e:2x2
jax: 0.10.0
libtpu: 0.0.40
codegen_flags: <defaults>
</compile_context>

<pallas_src>
import functools

import jax
import jax.numpy as jnp
from jax.experimental import pallas as pl
from jax.experimental.pallas import tpu as pltpu


def _layernorm_kernel(x_ref, w_ref, *rest, eps: float, has_bias: bool):
    # x_ref: (tile_rows, C); w_ref/b_ref: (1, C); o_ref: (tile_rows, C)
    if has_bias:
        b_ref, o_ref = rest
    else:
        (o_ref,) = rest

    x = x_ref[...].astype(jnp.float32)
    mean = jnp.mean(x, axis=-1, keepdims=True)
    xc = x - mean
    var = jnp.mean(xc * xc, axis=-1, keepdims=True)
    inv = jax.lax.rsqrt(var + eps)
    y = xc * inv * w_ref[...].astype(jnp.float32)
    if has_bias:
        y = y + b_ref[...].astype(jnp.float32)
    o_ref[...] = y.astype(o_ref.dtype)


def _pick_tile_rows(rows: int, C: int, in_bytes: int, out_bytes: int,
                    block_budget_bytes: int = 40 << 20) -> int:
    """Largest row tile whose double-buffered I/O blocks + ~2 f32 temporaries
    fit in `block_budget_bytes` (conservative enough for v7x's 64 MiB VMEM)."""
    bytes_per_row = C * (2 * in_bytes + 2 * out_bytes + 2 * 4)
    tr = block_budget_bytes // max(bytes_per_row, 1)
    tr = min(int(tr), 1024)          # per-step overhead already amortized here
    tr = max((tr // 8) * 8, 8)       # sublane-aligned
    if tr >= rows:
        return rows                  # full first dim -> always a legal block
    return tr


def layer_norm_pallas(x, weight, bias=None, eps: float = 1e-5,
                      tile_rows: int | None = None):
    """LayerNorm over the last axis of x with learnable scale and optional bias.

    x: (..., C); weight: (C,); bias: (C,) or None.
    """
    orig_shape = x.shape
    C = orig_shape[-1]
    rows = 1
    for d in orig_shape[:-1]:
        rows *= d
    x2 = x.reshape(rows, C)

    has_bias = bias is not None
    w2 = weight.reshape(1, C)

    in_bytes = jnp.dtype(x.dtype).itemsize
    out_bytes = in_bytes
    if tile_rows is None:
        tr = _pick_tile_rows(rows, C, in_bytes, out_bytes)
    else:
        tr = min(tile_rows, rows)
        if tr < rows:
            tr = max((tr // 8) * 8, 8)

    num_tiles = pl.cdiv(rows, tr)

    # Explicit scoped-VMEM limit sized to the blocks we actually request
    # (default scoped limits would reject large tiles); capped below v7x's
    # 64 MiB physical VMEM.
    needed = 2 * tr * C * (in_bytes + out_bytes) + 2 * tr * C * 4 + 8 * C * 4
    vmem_limit = int(min(56 << 20, max(int(needed * 1.5), 16 << 20)))

    # TODO(synk): for C < 128 (lane-sparse, e.g. C=32) a repacked layout using
    # a segmented per-row reduction would use all 128 lanes; kept simple here.
    kernel = functools.partial(_layernorm_kernel, eps=eps, has_bias=has_bias)

    in_specs = [
        pl.BlockSpec((tr, C), lambda i: (i, 0)),
        pl.BlockSpec((1, C), lambda i: (0, 0)),
    ]
    args = [x2, w2]
    if has_bias:
        in_specs.append(pl.BlockSpec((1, C), lambda i: (0, 0)))
        args.append(bias.reshape(1, C))

    out = pl.pallas_call(
        kernel,
        out_shape=jax.ShapeDtypeStruct((rows, C), x.dtype),
        grid_spec=pltpu.PrefetchScalarGridSpec(
            num_scalar_prefetch=0,
            grid=(num_tiles,),
            in_specs=in_specs,
            out_specs=pl.BlockSpec((tr, C), lambda i: (i, 0)),
        ),
        compiler_params=pltpu.CompilerParams(
            dimension_semantics=("parallel",),
            vmem_limit_bytes=vmem_limit,
        ),
    )(*args)

    return out.reshape(orig_shape)


if __name__ == "__main__":
    key = jax.random.PRNGKey(0)
    B, T, C = 2, 8, 32  # batch, seq, hidden (ndim = C)

    x = jax.random.normal(key, (B, T, C), dtype=jnp.float32)

    # Deterministic parameters (nn.Parameter(torch.ones / zeros), perturbed so
    # scale/shift are actually exercised).
    weight = jnp.ones((C,), jnp.float32) + 0.01 * jnp.arange(C, dtype=jnp.float32)
    bias = jnp.zeros((C,), jnp.float32) + 0.1

    eps = 1e-5
    mean = jnp.mean(x, axis=-1, keepdims=True)
    var = jnp.mean((x - mean) ** 2, axis=-1, keepdims=True)
    xhat = (x - mean) * jax.lax.rsqrt(var + eps)

    # bias=True path
    out = jax.block_until_ready(layer_norm_pallas(x, weight, bias, eps=eps))
    ref = xhat * weight + bias
    assert jnp.allclose(out, ref, atol=1e-5, rtol=1e-5), "mismatch (bias=True)"

    # bias=False path (no bias array / DMA stream at all)
    out_nb = jax.block_until_ready(layer_norm_pallas(x, weight, None, eps=eps))
    ref_nb = xhat * weight
    assert jnp.allclose(out_nb, ref_nb, atol=1e-5, rtol=1e-5), "mismatch (bias=False)"

    print("KERNEL_OK")
</pallas_src>

<mosaic_0001>
module attributes {stable_mosaic.version = 11 : i64} {
  func.func @_layernorm_kernel(%arg0: i32, %arg1: memref<16x32xf32, #tpu.memory_space<vmem>>, %arg2: memref<1x32xf32, #tpu.memory_space<vmem>>, %arg3: memref<1x32xf32, #tpu.memory_space<vmem>>, %arg4: memref<16x32xf32, #tpu.memory_space<vmem>>) attributes {dimension_semantics = [#tpu.dimension_semantics<parallel>], iteration_bounds = array<i64: 1>, scalar_prefetch = 0 : i64, scratch_operands = 0 : i64, tpu.core_type = #tpu.core_type<tc>, window_params = [{transform_indices = @transform_0, window_bounds = array<i64: 16, 32>}, {pipeline_mode = #tpu.pipeline_mode<synchronous>, transform_indices = @transform_1, window_bounds = array<i64: 1, 32>}, {pipeline_mode = #tpu.pipeline_mode<synchronous>, transform_indices = @transform_2, window_bounds = array<i64: 1, 32>}, {transform_indices = @transform_3, window_bounds = array<i64: 16, 32>}]} {
    %c0 = arith.constant 0 : index
    %c0_0 = arith.constant 0 : index
    %0 = vector.load %arg1[%c0, %c0_0] : memref<16x32xf32, #tpu.memory_space<vmem>>, vector<16x32xf32>
    %cst = arith.constant dense<0.000000e+00> : vector<16xf32>
    %1 = vector.multi_reduction <add>, %0, %cst [1] : vector<16x32xf32> to vector<16xf32>
    %2 = vector.shape_cast %1 : vector<16xf32> to vector<16x1xf32>
    %cst_1 = arith.constant 3.200000e+01 : f32
    %3 = vector.broadcast %cst_1 : f32 to vector<16x1xf32>
    %4 = arith.divf %2, %3 : vector<16x1xf32>
    %5 = vector.broadcast %4 : vector<16x1xf32> to vector<16x32xf32>
    %6 = arith.subf %0, %5 : vector<16x32xf32>
    %7 = arith.mulf %6, %6 : vector<16x32xf32>
    %cst_2 = arith.constant dense<0.000000e+00> : vector<16xf32>
    %8 = vector.multi_reduction <add>, %7, %cst_2 [1] : vector<16x32xf32> to vector<16xf32>
    %9 = vector.shape_cast %8 : vector<16xf32> to vector<16x1xf32>
    %cst_3 = arith.constant 3.200000e+01 : f32
    %10 = vector.broadcast %cst_3 : f32 to vector<16x1xf32>
    %11 = arith.divf %9, %10 : vector<16x1xf32>
    %cst_4 = arith.constant 9.99999974E-6 : f32
    %12 = vector.broadcast %cst_4 : f32 to vector<16x1xf32>
    %13 = arith.addf %11, %12 : vector<16x1xf32>
    %14 = math.rsqrt %13 : vector<16x1xf32>
    %15 = vector.broadcast %14 : vector<16x1xf32> to vector<16x32xf32>
    %16 = arith.mulf %6, %15 : vector<16x32xf32>
    %c0_5 = arith.constant 0 : index
    %c0_6 = arith.constant 0 : index
    %17 = vector.load %arg2[%c0_5, %c0_6] : memref<1x32xf32, #tpu.memory_space<vmem>>, vector<1x32xf32>
    %18 = vector.broadcast %17 : vector<1x32xf32> to vector<16x32xf32>
    %19 = arith.mulf %16, %18 : vector<16x32xf32>
    %c0_7 = arith.constant 0 : index
    %c0_8 = arith.constant 0 : index
    %20 = vector.load %arg3[%c0_7, %c0_8] : memref<1x32xf32, #tpu.memory_space<vmem>>, vector<1x32xf32>
    %21 = vector.broadcast %20 : vector<1x32xf32> to vector<16x32xf32>
    %22 = arith.addf %19, %21 : vector<16x32xf32>
    %c0_9 = arith.constant 0 : index
    %c0_10 = arith.constant 0 : index
    %23 = vector.load %arg4[%c0_9, %c0_10] : memref<16x32xf32, #tpu.memory_space<vmem>>, vector<16x32xf32>
    tpu.vector_store %arg4[%c0_9, %c0_10], %22 {strides = array<i32>} : memref<16x32xf32, #tpu.memory_space<vmem>>, vector<16x32xf32>,
    return
  }
  func.func @transform_0(%arg0: i32) -> (i32, i32) {
    %c0_i32 = arith.constant 0 : i32
    %c0_i32_0 = arith.constant 0 : i32
    return %arg0, %c0_i32 : i32, i32
  }
  func.func @transform_1(%arg0: i32) -> (i32, i32) {
    %c0_i32 = arith.constant 0 : i32
    %c0_i32_0 = arith.constant 0 : i32
    %c0_i32_1 = arith.constant 0 : i32
    return %c0_i32, %c0_i32_0 : i32, i32
  }
  func.func @transform_2(%arg0: i32) -> (i32, i32) {
    %c0_i32 = arith.constant 0 : i32
    %c0_i32_0 = arith.constant 0 : i32
    %c0_i32_1 = arith.constant 0 : i32
    return %c0_i32, %c0_i32_0 : i32, i32
  }
  func.func @transform_3(%arg0: i32) -> (i32, i32) {
    %c0_i32 = arith.constant 0 : i32
    %c0_i32_0 = arith.constant 0 : i32
    return %arg0, %c0_i32 : i32, i32
  }
}

</mosaic_0001>

<bundles_post_ra>
// kernel: tpu_custom_call.1
= control target key start
LH: loop header
LB: loop body
LE: loop exit
PB: predicated region body
PF: predicated region fallthrough
CT: control target
= control target key end

     0   :  { %8 = vsyncpa [#allocation3], 0  ;;  %s275_s0 = inlined_call_operand.hbm [shape: f32[16,32], index: 0, kind: input, shape index: {}]   ;;  %s276_s1 = inlined_call_operand.hbm [shape: f32[1,32], index: 1, kind: input, shape index: {}]   ;;  %s277_s2 = inlined_call_operand.vmem [shape: f32[1,32], index: 2, kind: input, shape index: {}]   ;;  %s278_s3 = inlined_call_operand.hbm [shape: f32[16,32], index: 3, kind: output, shape index: {}]  }
   0x1   :  { %9 = vsyncpa [#allocation6], 0 }
   0x2   :  { %10 = vsyncpa [#allocation4], 0  ;;  %s15_s14 = sshll.u32 %s275_s0, 4  ;;  %s225_s15 = smov [#allocation2]   ;;  %s16_s14 = int_to_ptr.hbm [resolvable:$true] %s15_s14 }
   0x3   :  { %s17_s16 = sshll.u32 %s225_s15, 4  ;;  %s29_s19 = sshll.u32 %s276_s1, 4  ;;  %s18_s16 = int_to_ptr.vmem [resolvable:$true] %s17_s16  ;;  %s30_s19 = int_to_ptr.hbm [resolvable:$true] %s29_s19 }
   0x4   :  { %s226_s20 = smov 128   ;;  %s227_s21 = smov 8  }
   0x5   :  { %23 = dma.hbm_to_vmem [thread:$0]  %s16_s14, 256, %s18_s16, [#allocation3], %s226_s20, %s226_s20, %s227_s21  }
   0x6   :  { %s228_s22 = smov [#allocation5]  }
   0x7   :  { %s31_s23 = sshll.u32 %s228_s22, 4  ;;  %s32_s23 = int_to_ptr.vmem [resolvable:$true] %s31_s23 }
   0x8   :  { %34 = dma.hbm_to_vmem [thread:$0]  %s30_s19, 16, %s32_s23, [#allocation6]  }
   0x9   :  { %219 = dma.done.wait [#allocation3], 256  }
   0xa   :  { %220 = vsyncadd [#allocation3], 4294967040 }
   0xb   :  { %221 = dma.done.wait [#allocation6], 16  }
   0xc   :  { %222 = vsyncadd [#allocation6], 4294967280  ;;  %vm47_vm0 = vcmask 261120   ;;  %v45_v0 = vld [vmem:[#allocation2] sm:$0xff]  ;;  %v46_v2 = vld [vmem:[#allocation2 + $0x8] sm:$0xff]  ;;  %v229_v4 = vmov 32.0  }
   0xd   :  { %v48_v1 = vsel %vm47_vm0, %v45_v0, 0.0  ;;  %v51_v3 = vsel %vm47_vm0, %v46_v2, 0.0  ;;  %141 = vrcp.f32 %v229_v4  ;;  %v139_v35 = vld [vmem:[#allocation5] ss:$0 sm:$0xff]  ;;  %v140_v39 = vld [vmem:[%s277_s2] ss:$0 sm:$0xff] }
   0xe   :  { %49 = vadd.xlane.f32.xlu0 %v48_v1  ;;  %s230_s24 = smov [#allocation7]   ;;  %s119_s28 = sshll.u32 %s278_s3, 4  ;;  %s120_s28 = int_to_ptr.hbm [resolvable:$true] %s119_s28 }
   0xf   :  { %s117_s25 = sshll.u32 %s230_s24, 4  ;;  %s118_s25 = int_to_ptr.vmem [resolvable:$true] %s117_s25 }
  0x13   :  { %v142_v5 = vpop.eup %141 }
  0x14   :  { %v55_v6 = vmul.f32 32.0, %v142_v5  ;;  %vm59_vm1 = vweird.f32 %v142_v5 }
  0x16   :  { %52 = vadd.xlane.f32.xlu0 %v51_v3  ;;  %v56_v7 = vsub.f32 1.0, %v55_v6 }
  0x18   :  { %v57_v8 = vmul.f32 %v142_v5, %v56_v7 }
  0x1a   :  { %v58_v9 = vadd.f32 %v142_v5, %v57_v8 }
  0x1c   :  { %v60_v10 = vsel %vm59_vm1, %v142_v5, %v58_v9 }
  0x81   :  { %v50_v11 = vpop.xlane.xlu0 %49 }
  0x82   :  { %v61_v12 = vmul.f32 %v60_v10, %v50_v11 }
  0x84   :  { %v63_v13 = vsub.f32 %v45_v0, %v61_v12 }
  0x86   :  { %v65_v14 = vmul.f32 %v63_v13, %v63_v13 }
  0x88   :  { %v67_v15 = vsel %vm47_vm0, %v65_v14, 0.0 }
  0x89   :  { %68 = vadd.xlane.f32.xlu1 %v67_v15  ;;  %v53_v16 = vpop.xlane.xlu0 %52 }
  0x8a   :  { %v62_v17 = vmul.f32 %v60_v10, %v53_v16 }
  0x8c   :  { %v64_v18 = vsub.f32 %v46_v2, %v62_v17 }
  0x8e   :  { %v66_v19 = vmul.f32 %v64_v18, %v64_v18 }
  0x90   :  { %v70_v20 = vsel %vm47_vm0, %v66_v19, 0.0 }
  0x91   :  { %71 = vadd.xlane.f32.xlu1 %v70_v20 }
  0xfc   :  { %v69_v21 = vpop.xlane.xlu1 %68 }
  0xfd   :  { %v73_v22 = vmul.f32 %v69_v21, %v60_v10 }
  0xff   :  { %v75_v23 = vadd.f32 1e-05, %v73_v22 }
 0x101   :  { %143 = vrsqrt.f32 %v75_v23  ;;  %vm83_vm3 = vweird.f32 %v75_v23 }
 0x104   :  { %v72_v24 = vpop.xlane.xlu1 %71 }
 0x105   :  { %v74_v25 = vmul.f32 %v72_v24, %v60_v10 }
 0x107   :  { %v144_v26 = vpop.eup %143  ;;  %v76_v27 = vadd.f32 1e-05, %v74_v25 }
 0x108   :  { %v78_v28 = vmul.f32 %v144_v26, %v75_v23  ;;  %vm84_vm2 = vweird.f32 %v144_v26 }
 0x109   :  { %145 = vrsqrt.f32 %v76_v27  ;;  %vm85_vm4 = vmor %vm83_vm3, %vm84_vm2  ;;  %vm93_vm6 = vweird.f32 %v76_v27 }
 0x10a   :  { %v79_v29 = vmul.f32 %v144_v26, %v78_v28 }
 0x10c   :  { %v80_v30 = vmul.f32 0.5, %v79_v29 }
 0x10e   :  { %v81_v31 = vsub.f32 1.5, %v80_v30 }
 0x10f   :  { %v146_v32 = vpop.eup %145 }
 0x110   :  { %v82_v33 = vmul.f32 %v144_v26, %v81_v31  ;;  %v88_v34 = vmul.f32 %v146_v32, %v76_v27  ;;  %vm94_vm5 = vweird.f32 %v146_v32 }
 0x111   :  { %vm95_vm7 = vmor %vm93_vm6, %vm94_vm5 }
 0x112   :  { %v86_v36 = vsel %vm85_vm4, %v144_v26, %v82_v33  ;;  %v89_v37 = vmul.f32 %v146_v32, %v88_v34 }
 0x113   :  { %v97_v38 = vmul.f32 %v86_v36, %v63_v13 }
 0x114   :  { %v90_v40 = vmul.f32 0.5, %v89_v37 }
 0x115   :  { %v103_v41 = vmul.f32 %v139_v35, %v97_v38 }
 0x116   :  { %v91_v42 = vsub.f32 1.5, %v90_v40 }
 0x117   :  { %v109_v43 = vadd.f32 %v140_v39, %v103_v41 }
 0x118   :  { %v92_v44 = vmul.f32 %v146_v32, %v91_v42 }
 0x119   :  { %111 = vst.msk [vmem:[#allocation7] sm:$0xff] %vm47_vm0, %v109_v43 }
 0x11a   :  { %v96_v45 = vsel %vm95_vm7, %v146_v32, %v92_v44 }
 0x11b   :  { %v98_v46 = vmul.f32 %v96_v45, %v64_v18 }
 0x11d   :  { %v104_v47 = vmul.f32 %v139_v35, %v98_v46 }
 0x11f   :  { %v110_v48 = vadd.f32 %v140_v39, %v104_v47 }
 0x121   :  { %112 = vst.msk [vmem:[#allocation7 + $0x8] sm:$0xff] %vm47_vm0, %v110_v48 }
 0x122   :  { %125 = dma.vmem_to_hbm [thread:$0]  %s118_s25, 256, %s120_s28, [#allocation4], %s226_s20, %s226_s20, %s227_s21  }
 0x123   :  { %223 = dma.done.wait [#allocation4], 256  }
 0x124   :  { %224 = vsyncadd [#allocation4], 4294967040 }
 0x125   :  { %130 = vsyncpa [#allocation3], 1 }
 0x126   :  { %131 = vsyncpa [#allocation6], 1 }
 0x127   :  { %132 = vsyncpa [#allocation4], 1 }

</bundles_post_ra>
